<compile_context>
chip_gen: v7x
topology: tpu7x:2x2x1
jax: 0.10.0
libtpu: 0.0.40
codegen_flags: <defaults>
</compile_context>

<pallas_src>
import functools

import jax
import jax.numpy as jnp
from jax.experimental import pallas as pl
from jax.experimental.pallas import tpu as pltpu

EPS = 1e-5


def _round_up(x, m):
    return ((x + m - 1) // m) * m


def _vmem_limit_bytes():
    """~3/4 of physical VMEM: 96 MiB on v5e/v6e, 48 MiB on v7x."""
    default_cap = 64 * 1024 * 1024
    try:
        cap = getattr(pltpu.get_tpu_info(), "vmem_capacity_bytes", default_cap)
    except Exception:  # pragma: no cover - trace-time query not available
        cap = default_cap
    return int(min(96 * 1024 * 1024, (cap * 3) // 4))


# ---------------------------------------------------------------------------
# Stage 1: streamed GAP sum (grid: parallel B tiles x arbitrary HW tiles)
# ---------------------------------------------------------------------------
def _gap_kernel(feat_ref, pooled_ref, acc_ref, *, inv_hw, use_mxu):
    h = pl.program_id(1)

    @pl.when(h == 0)
    def _():
        acc_ref[...] = jnp.zeros_like(acc_ref)

    if use_mxu:
        # MXU reduction: ones[b,1,t_hw] (bf16) @ feat[b,t_hw,C] (bf16), f32 acc.
        # Keeps stage 1 HBM-bound (no f32 upcast of the tile, no VALU
        # cross-sublane reduce) — matters most at v7x HBM rates.
        ones = jnp.ones((feat_ref.shape[0], 1, feat_ref.shape[1]),
                        feat_ref.dtype)
        acc_ref[...] += jnp.einsum("bqh,bhc->bqc", ones, feat_ref[...],
                                   preferred_element_type=jnp.float32)
    else:
        acc_ref[...] += jnp.sum(feat_ref[...].astype(jnp.float32), axis=1,
                                keepdims=True)

    @pl.when(h == pl.num_programs(1) - 1)
    def _():
        pooled_ref[...] = acc_ref[...] * inv_hw  # mean: 1/HW folded once


# ---------------------------------------------------------------------------
# Stage 2: BN1 -> FC1 -> ReLU -> BN2 -> FC2 -> BN3 on the FULL batch.
# Batch stats are masked so padded batch rows never contaminate them.
# ---------------------------------------------------------------------------
def _bn_train_masked(x, mask, inv_b, gamma, beta):
    mu = jnp.sum(x * mask, axis=0, keepdims=True) * inv_b
    d = (x - mu) * mask
    var = jnp.sum(d * d, axis=0, keepdims=True) * inv_b   # biased batch var
    return (x - mu) * jax.lax.rsqrt(var + EPS) * gamma + beta


def _mlp_head_kernel(pooled_ref, mask_ref,
                     g1_ref, bt1_ref, w1_ref, b1_ref,
                     g2_ref, bt2_ref, w2_ref, b2_ref,
                     g3_ref, bt3_ref,
                     x_ref, *, inv_b):
    mask = mask_ref[...]
    x = _bn_train_masked(pooled_ref[...], mask, inv_b,
                         g1_ref[...], bt1_ref[...])                     # BN1
    x = jnp.dot(x.astype(jnp.bfloat16), w1_ref[...],                    # FC1
                preferred_element_type=jnp.float32) + b1_ref[...]
    x = jnp.maximum(x, 0.0)                                             # ReLU
    x = _bn_train_masked(x, mask, inv_b, g2_ref[...], bt2_ref[...])     # BN2
    x = jnp.dot(x.astype(jnp.bfloat16), w2_ref[...],                    # FC2
                preferred_element_type=jnp.float32) + b2_ref[...]
    x = _bn_train_masked(x, mask, inv_b, g3_ref[...], bt3_ref[...])     # BN3
    x_ref[...] = x.astype(x_ref.dtype)                                  # bf16


# ---------------------------------------------------------------------------
# Stage 3: last_fc, tiled over the (lane-dense, padded) class dimension.
# bf16 x bf16 MXU dot, f32 accumulate + f32 bias, f32 out.
# ---------------------------------------------------------------------------
def _last_fc_kernel(x_ref, wl_ref, bl_ref, out_ref):
    out = jnp.dot(x_ref[...], wl_ref[...],
                  preferred_element_type=jnp.float32) + bl_ref[...]
    out_ref[...] = out.astype(out_ref.dtype)


# ---------------------------------------------------------------------------
# Wrapper
# ---------------------------------------------------------------------------
def arcface_head(feat, params, *, b_tile=None, t_hw=None, t_k=2048):
    """feat: [B, HW, C] float32 backbone feature map. Returns logits [B, K]."""
    B, HW, C = feat.shape
    F = params["w1"].shape[1]
    K = params["wl"].shape[1]

    vmem_limit = _vmem_limit_bytes()

    # ---------------- batch padding to a sublane multiple (8) ---------------
    b_pad = _round_up(B, 8)
    feat_bf16 = feat.astype(jnp.bfloat16)            # halve HBM bytes for feat
    if b_pad != B:
        feat_bf16 = jnp.pad(feat_bf16, ((0, b_pad - B), (0, 0), (0, 0)))

    if b_tile is None:
        b_tile = min(b_pad, 32)
    b_tile = min(_round_up(b_tile, 8), b_pad)
    while b_pad % b_tile:
        b_tile -= 8
    n_b = b_pad // b_tile

    # --------------- spatial tiling: bound double-buffered feat VMEM --------
    if t_hw is None:
        per_buf_budget = 8 * 1024 * 1024             # bytes per feat buffer
        t_hw = max(8, per_buf_budget // (b_tile * C * 2))
    t_hw = _round_up(t_hw, 8)
    t_hw = min(t_hw, _round_up(HW, 8))
    hw_pad = _round_up(HW, t_hw)
    if hw_pad != HW:
        # zero-pad spatial dim: the sum is unaffected, we divide by true HW.
        feat_bf16 = jnp.pad(feat_bf16, ((0, 0), (0, hw_pad - HW), (0, 0)))
    n_hw = hw_pad // t_hw

    gap_cost = pl.CostEstimate(
        flops=int(2 * b_pad * hw_pad * C),
        transcendentals=0,
        bytes_accessed=int(feat_bf16.size * 2 + b_pad * C * 4),
    )

    def _run_gap(use_mxu):
        return pl.pallas_call(
            functools.partial(_gap_kernel, inv_hw=1.0 / HW, use_mxu=use_mxu),
            out_shape=jax.ShapeDtypeStruct((b_pad, 1, C), jnp.float32),
            grid=(n_b, n_hw),
            in_specs=[pl.BlockSpec((b_tile, t_hw, C), lambda b, h: (b, h, 0))],
            out_specs=pl.BlockSpec((b_tile, 1, C), lambda b, h: (b, 0, 0)),
            scratch_shapes=[pltpu.VMEM((b_tile, 1, C), jnp.float32)],
            compiler_params=pltpu.CompilerParams(
                dimension_semantics=("parallel", "arbitrary"),
                vmem_limit_bytes=vmem_limit,
            ),
            cost_estimate=gap_cost,
        )(feat_bf16)

    try:
        pooled = _run_gap(True)      # MXU ones-matmul spatial reduce
    except Exception:
        pooled = _run_gap(False)     # safe VALU-sum fallback
    pooled2d = pooled.reshape(b_pad, C)

    # ---------------- full-batch BN/MLP head -> x [B_pad, F] bf16 -----------
    w1 = params["w1"].astype(jnp.bfloat16)           # bf16 weights, f32 accum
    w2 = params["w2"].astype(jnp.bfloat16)
    mask = (jnp.arange(b_pad) < B).astype(jnp.float32).reshape(b_pad, 1)

    x = pl.pallas_call(
        functools.partial(_mlp_head_kernel, inv_b=1.0 / B),
        out_shape=jax.ShapeDtypeStruct((b_pad, F), jnp.bfloat16),
        compiler_params=pltpu.CompilerParams(vmem_limit_bytes=vmem_limit),
    )(pooled2d, mask,
      params["g1"], params["bt1"], w1, params["b1"],
      params["g2"], params["bt2"], w2, params["b2"],
      params["g3"], params["bt3"])

    # ---------------- last_fc tiled over padded class dim -------------------
    t_k = min(_round_up(t_k, 128), _round_up(K, 128))
    k_pad = _round_up(K, t_k)                        # pad K UP to multiple of t_k
    n_k = k_pad // t_k

    wl = params["wl"].astype(jnp.bfloat16)           # big classifier weight
    bl = params["bl"].astype(jnp.float32)
    if k_pad != K:
        wl = jnp.pad(wl, ((0, 0), (0, k_pad - K)))
        bl = jnp.pad(bl, ((0, 0), (0, k_pad - K)))

    fc_cost = pl.CostEstimate(
        flops=int(2 * b_pad * F * k_pad),
        transcendentals=0,
        bytes_accessed=int(F * k_pad * 2 + b_pad * F * 2
                           + b_pad * k_pad * 4 + k_pad * 4),
    )

    logits_pad = pl.pallas_call(
        _last_fc_kernel,
        out_shape=jax.ShapeDtypeStruct((b_pad, k_pad), jnp.float32),
        grid=(n_k,),
        in_specs=[
            pl.BlockSpec((b_pad, F), lambda k: (0, 0)),   # x resident
            pl.BlockSpec((F, t_k), lambda k: (0, k)),     # stream wl tiles
            pl.BlockSpec((1, t_k), lambda k: (0, k)),
        ],
        out_specs=pl.BlockSpec((b_pad, t_k), lambda k: (0, k)),
        compiler_params=pltpu.CompilerParams(
            dimension_semantics=("parallel",),            # K tiles independent
            vmem_limit_bytes=vmem_limit,
        ),
        cost_estimate=fc_cost,
    )(x, wl, bl)

    return logits_pad[:B, :K]


# ---------------------------------------------------------------------------
# Parameters / reference
# ---------------------------------------------------------------------------
def make_params(key, C, F, K):
    """Deterministic synthetic parameters. Linear weights stored pre-transposed
    ([in, out]); this is the only glue transpose vs. PyTorch's [out, in]."""
    ks = jax.random.split(key, 10)
    return {
        "g1":  1.0 + 0.1 * jax.random.normal(ks[0], (1, C), jnp.float32),
        "bt1": 0.1 * jax.random.normal(ks[1], (1, C), jnp.float32),
        "g2":  1.0 + 0.1 * jax.random.normal(ks[2], (1, F), jnp.float32),
        "bt2": 0.1 * jax.random.normal(ks[3], (1, F), jnp.float32),
        "g3":  1.0 + 0.1 * jax.random.normal(ks[4], (1, F), jnp.float32),
        "bt3": 0.1 * jax.random.normal(ks[5], (1, F), jnp.float32),
        "w1": 0.02 * jax.random.normal(ks[6], (C, F), jnp.float32),
        "b1": 0.02 * jax.random.normal(ks[7], (1, F), jnp.float32),
        "w2": 0.02 * jax.random.normal(ks[8], (F, F), jnp.float32),
        "b2": jnp.zeros((1, F), jnp.float32),
        "wl": 0.02 * jax.random.normal(ks[9], (F, K), jnp.float32),
        "bl": jnp.zeros((1, K), jnp.float32),
    }


def _bn_train(x, gamma, beta):
    """BatchNorm1d training mode: batch mean / biased batch var over axis 0."""
    mu = jnp.mean(x, axis=0, keepdims=True)
    var = jnp.mean((x - mu) ** 2, axis=0, keepdims=True)
    return (x - mu) * jax.lax.rsqrt(var + EPS) * gamma + beta


def _bf16(a):
    return a.astype(jnp.bfloat16).astype(jnp.float32)


def reference_head(feat, p):
    """Pure-JAX reference mirroring the kernels' intentional bf16 storage of
    feat / w1 / w2 / wl and of the matmul operands (f32 accumulation)."""
    x = jnp.mean(_bf16(feat), axis=1)
    x = _bn_train(x, p["g1"], p["bt1"])
    x = jnp.maximum(_bf16(x) @ _bf16(p["w1"]) + p["b1"], 0.0)
    x = _bn_train(x, p["g2"], p["bt2"])
    x = _bf16(x) @ _bf16(p["w2"]) + p["b2"]
    x = _bn_train(x, p["g3"], p["bt3"])
    return _bf16(x) @ _bf16(p["wl"]) + p["bl"]


if __name__ == "__main__":
    # Small shapes: batch=12 (exercises B padding to 16 and two B tiles),
    # backbone feature map 4x4 spatial (HW=16 -> two streamed HW tiles at
    # t_hw=8), final_in_features C=128, fc_dim F=128, class_num K=200
    # (padded to 256 -> two classifier tiles at t_k=128).
    B, HW, C, F, K = 12, 16, 128, 128, 200

    key = jax.random.PRNGKey(0)
    k_feat, k_param = jax.random.split(key)

    # Stand-in for backbone(x) output, reshaped NCHW -> [B, H*W, C].
    feat = jax.random.normal(k_feat, (B, HW, C), jnp.float32)
    params = make_params(k_param, C, F, K)

    out = arcface_head(feat, params, b_tile=8, t_hw=8, t_k=128)
    out = jax.block_until_ready(out)

    ref = reference_head(feat, params)
    assert out.shape == (B, K)
    max_err = float(jnp.max(jnp.abs(out - ref)))
    assert jnp.allclose(out, ref, atol=2e-3, rtol=2e-3), \
        f"mismatch vs JAX reference (max abs err {max_err})"

    print("KERNEL_OK")
</pallas_src>

<mosaic_0001>
module attributes {stable_mosaic.version = 11 : i64} {
  func.func @_gap_kernel(%arg0: i32, %arg1: i32, %arg2: memref<8x8x128xbf16, #tpu.memory_space<vmem>>, %arg3: memref<8x1x128xf32, #tpu.memory_space<vmem>>, %arg4: memref<8x1x128xf32, #tpu.memory_space<vmem>>) attributes {dimension_semantics = [#tpu.dimension_semantics<parallel>, #tpu.dimension_semantics<arbitrary>], iteration_bounds = array<i64: 2, 2>, scalar_prefetch = 0 : i64, scratch_operands = 1 : i64, tpu.core_type = #tpu.core_type<tc>, window_params = [{transform_indices = @transform_0, window_bounds = array<i64: 8, 8, 128>}, {transform_indices = @transform_1, window_bounds = array<i64: 8, 1, 128>}]} {
    %c0_i32 = arith.constant 0 : i32
    %0 = arith.cmpi eq, %arg1, %c0_i32 : i32
    %1 = arith.extui %0 : i1 to i32
    %c0_i32_0 = arith.constant 0 : i32
    %2 = arith.cmpi ne, %1, %c0_i32_0 : i32
    scf.if %2 {
      %cst_11 = arith.constant 0.000000e+00 : f32
      %12 = vector.broadcast %cst_11 : f32 to vector<8x1x128xf32>
      %c0_12 = arith.constant 0 : index
      %c0_13 = arith.constant 0 : index
      %c0_14 = arith.constant 0 : index
      %13 = vector.load %arg4[%c0_12, %c0_13, %c0_14] : memref<8x1x128xf32, #tpu.memory_space<vmem>>, vector<8x1x128xf32>
      tpu.vector_store %arg4[%c0_12, %c0_13, %c0_14], %12 {strides = array<i32>} : memref<8x1x128xf32, #tpu.memory_space<vmem>>, vector<8x1x128xf32>,
    } else {
    }
    %cst = arith.constant 1.000000e+00 : bf16
    %3 = vector.broadcast %cst : bf16 to vector<8x1x8xbf16>
    %c0 = arith.constant 0 : index
    %c0_1 = arith.constant 0 : index
    %c0_2 = arith.constant 0 : index
    %4 = vector.load %arg4[%c0, %c0_1, %c0_2] : memref<8x1x128xf32, #tpu.memory_space<vmem>>, vector<8x1x128xf32>
    %c0_3 = arith.constant 0 : index
    %c0_4 = arith.constant 0 : index
    %c0_5 = arith.constant 0 : index
    %5 = vector.load %arg2[%c0_3, %c0_4, %c0_5] : memref<8x8x128xbf16, #tpu.memory_space<vmem>>, vector<8x8x128xbf16>
    "tpu.trace_start"() <{level = 10 : i32, message = "bqh,bhc->bqc"}> : () -> ()
    %cst_6 = arith.constant dense<0.000000e+00> : vector<8x1x128xf32>
    %6 = tpu.matmul %3, %5, %cst_6 {dimension_numbers = #tpu.dot_dimension_numbers<[2], [1], [1], [2], [0, 0, 0, 1, 1, 2], [0], [0]>} : vector<8x1x8xbf16>, vector<8x8x128xbf16>, vector<8x1x128xf32> -> vector<8x1x128xf32>
    "tpu.trace_stop"() : () -> ()
    %7 = arith.addf %4, %6 : vector<8x1x128xf32>
    %c0_7 = arith.constant 0 : index
    %c0_8 = arith.constant 0 : index
    %c0_9 = arith.constant 0 : index
    %8 = vector.load %arg4[%c0_7, %c0_8, %c0_9] : memref<8x1x128xf32, #tpu.memory_space<vmem>>, vector<8x1x128xf32>
    tpu.vector_store %arg4[%c0_7, %c0_8, %c0_9], %7 {strides = array<i32>} : memref<8x1x128xf32, #tpu.memory_space<vmem>>, vector<8x1x128xf32>,
    %c1_i32 = arith.constant 1 : i32
    %9 = arith.cmpi eq, %arg1, %c1_i32 : i32
    %10 = arith.extui %9 : i1 to i32
    %c0_i32_10 = arith.constant 0 : i32
    %11 = arith.cmpi ne, %10, %c0_i32_10 : i32
    scf.if %11 {
      %c0_11 = arith.constant 0 : index
      %c0_12 = arith.constant 0 : index
      %c0_13 = arith.constant 0 : index
      %12 = vector.load %arg4[%c0_11, %c0_12, %c0_13] : memref<8x1x128xf32, #tpu.memory_space<vmem>>, vector<8x1x128xf32>
      %cst_14 = arith.constant 6.250000e-02 : f32
      %13 = vector.broadcast %cst_14 : f32 to vector<8x1x128xf32>
      %14 = arith.mulf %12, %13 : vector<8x1x128xf32>
      %c0_15 = arith.constant 0 : index
      %c0_16 = arith.constant 0 : index
      %c0_17 = arith.constant 0 : index
      %15 = vector.load %arg3[%c0_15, %c0_16, %c0_17] : memref<8x1x128xf32, #tpu.memory_space<vmem>>, vector<8x1x128xf32>
      tpu.vector_store %arg3[%c0_15, %c0_16, %c0_17], %14 {strides = array<i32>} : memref<8x1x128xf32, #tpu.memory_space<vmem>>, vector<8x1x128xf32>,
    } else {
    }
    return
  }
  func.func @transform_0(%arg0: i32, %arg1: i32) -> (i32, i32, i32) {
    %c0_i32 = arith.constant 0 : i32
    %c0_i32_0 = arith.constant 0 : i32
    return %arg0, %arg1, %c0_i32 : i32, i32, i32
  }
  func.func @transform_1(%arg0: i32, %arg1: i32) -> (i32, i32, i32) {
    %c0_i32 = arith.constant 0 : i32
    %c0_i32_0 = arith.constant 0 : i32
    %c0_i32_1 = arith.constant 0 : i32
    return %arg0, %c0_i32, %c0_i32_0 : i32, i32, i32
  }
}

module attributes {stable_mosaic.version = 11 : i64} {
  func.func @_gap_kernel(%arg0: i32, %arg1: i32, %arg2: memref<8x8x128xbf16, #tpu.memory_space<vmem>>, %arg3: memref<8x1x128xf32, #tpu.memory_space<vmem>>, %arg4: memref<8x1x128xf32, #tpu.memory_space<vmem>>) attributes {dimension_semantics = [#tpu.dimension_semantics<parallel>, #tpu.dimension_semantics<arbitrary>], iteration_bounds = array<i64: 2, 2>, scalar_prefetch = 0 : i64, scratch_operands = 1 : i64, tpu.core_type = #tpu.core_type<tc>, window_params = [{transform_indices = @transform_0, window_bounds = array<i64: 8, 8, 128>}, {transform_indices = @transform_1, window_bounds = array<i64: 8, 1, 128>}]} {
    %c0_i32 = arith.constant 0 : i32
    %0 = arith.cmpi eq, %arg1, %c0_i32 : i32
    %1 = arith.extui %0 : i1 to i32
    %c0_i32_0 = arith.constant 0 : i32
    %2 = arith.cmpi ne, %1, %c0_i32_0 : i32
    scf.if %2 {
      %cst_10 = arith.constant 0.000000e+00 : f32
      %13 = vector.broadcast %cst_10 : f32 to vector<8x1x128xf32>
      %c0_11 = arith.constant 0 : index
      %c0_12 = arith.constant 0 : index
      %c0_13 = arith.constant 0 : index
      %14 = vector.load %arg4[%c0_11, %c0_12, %c0_13] : memref<8x1x128xf32, #tpu.memory_space<vmem>>, vector<8x1x128xf32>
      tpu.vector_store %arg4[%c0_11, %c0_12, %c0_13], %13 {strides = array<i32>} : memref<8x1x128xf32, #tpu.memory_space<vmem>>, vector<8x1x128xf32>,
    } else {
    }
    %c0 = arith.constant 0 : index
    %c0_1 = arith.constant 0 : index
    %c0_2 = arith.constant 0 : index
    %3 = vector.load %arg4[%c0, %c0_1, %c0_2] : memref<8x1x128xf32, #tpu.memory_space<vmem>>, vector<8x1x128xf32>
    %c0_3 = arith.constant 0 : index
    %c0_4 = arith.constant 0 : index
    %c0_5 = arith.constant 0 : index
    %4 = vector.load %arg2[%c0_3, %c0_4, %c0_5] : memref<8x8x128xbf16, #tpu.memory_space<vmem>>, vector<8x8x128xbf16>
    %5 = arith.extf %4 : vector<8x8x128xbf16> to vector<8x8x128xf32>
    %cst = arith.constant dense<0.000000e+00> : vector<8x128xf32>
    %6 = vector.multi_reduction <add>, %5, %cst [1] : vector<8x8x128xf32> to vector<8x128xf32>
    %7 = vector.shape_cast %6 : vector<8x128xf32> to vector<8x1x128xf32>
    %8 = arith.addf %3, %7 : vector<8x1x128xf32>
    %c0_6 = arith.constant 0 : index
    %c0_7 = arith.constant 0 : index
    %c0_8 = arith.constant 0 : index
    %9 = vector.load %arg4[%c0_6, %c0_7, %c0_8] : memref<8x1x128xf32, #tpu.memory_space<vmem>>, vector<8x1x128xf32>
    tpu.vector_store %arg4[%c0_6, %c0_7, %c0_8], %8 {strides = array<i32>} : memref<8x1x128xf32, #tpu.memory_space<vmem>>, vector<8x1x128xf32>,
    %c1_i32 = arith.constant 1 : i32
    %10 = arith.cmpi eq, %arg1, %c1_i32 : i32
    %11 = arith.extui %10 : i1 to i32
    %c0_i32_9 = arith.constant 0 : i32
    %12 = arith.cmpi ne, %11, %c0_i32_9 : i32
    scf.if %12 {
      %c0_10 = arith.constant 0 : index
      %c0_11 = arith.constant 0 : index
      %c0_12 = arith.constant 0 : index
      %13 = vector.load %arg4[%c0_10, %c0_11, %c0_12] : memref<8x1x128xf32, #tpu.memory_space<vmem>>, vector<8x1x128xf32>
      %cst_13 = arith.constant 6.250000e-02 : f32
      %14 = vector.broadcast %cst_13 : f32 to vector<8x1x128xf32>
      %15 = arith.mulf %13, %14 : vector<8x1x128xf32>
      %c0_14 = arith.constant 0 : index
      %c0_15 = arith.constant 0 : index
      %c0_16 = arith.constant 0 : index
      %16 = vector.load %arg3[%c0_14, %c0_15, %c0_16] : memref<8x1x128xf32, #tpu.memory_space<vmem>>, vector<8x1x128xf32>
      tpu.vector_store %arg3[%c0_14, %c0_15, %c0_16], %15 {strides = array<i32>} : memref<8x1x128xf32, #tpu.memory_space<vmem>>, vector<8x1x128xf32>,
    } else {
    }
    return
  }
  func.func @transform_0(%arg0: i32, %arg1: i32) -> (i32, i32, i32) {
    %c0_i32 = arith.constant 0 : i32
    %c0_i32_0 = arith.constant 0 : i32
    return %arg0, %arg1, %c0_i32 : i32, i32, i32
  }
  func.func @transform_1(%arg0: i32, %arg1: i32) -> (i32, i32, i32) {
    %c0_i32 = arith.constant 0 : i32
    %c0_i32_0 = arith.constant 0 : i32
    %c0_i32_1 = arith.constant 0 : i32
    return %arg0, %c0_i32, %c0_i32_0 : i32, i32, i32
  }
}

</mosaic_0001>

<bundles_post_ra>
// kernel: tpu_custom_call.1
= control target key start
LH: loop header
LB: loop body
LE: loop exit
PB: predicated region body
PF: predicated region fallthrough
CT: control target
= control target key end

     0   :  { %6 = vsyncpa [#allocation4], 0  ;;  %s1325_s0 = inlined_call_operand.hbm [shape: bf16[16,16,128], index: 0, kind: input, shape index: {}]   ;;  %s1326_s1 = inlined_call_operand.hbm [shape: f32[16,1,128], index: 1, kind: output, shape index: {}]  }
   0x1   :  { %8 = vsyncpa [#allocation4 + $0x1], 0 }
   0x2   :  { %9 = vsyncpa [#allocation5], 0 }
   0x3   :  { %11 = vsyncpa [#allocation5 + $0x1], 0  ;;  %s1054_s6 = smov 0   ;;  %s1056_s7 = smov 0  }
   0x4   :  { %s1058_s8 = smov 0   ;;  %s1060_s9 = smov 0  }
   0x5   :  { %s1062_s10 = smov 0   ;;  %s1064_s11 = smov 0  }
   0x6   :  { %s1066_s12 = smov 0   ;;  %s1068_s13 = smov 0  }
   0x7   :  { %s1070_s14 = smov 0   ;;  %s1072_s15 = smov 0  }
   0x8   :  { %s1074_s16 = smov 0  }
   0x9 LB: > { %s676_s17 = sadd.s32 4294967295, %s1031_s16   ;;  %s677_s18 = sadd.s32 4294967294, %s1031_s16   ;;  %s1031_s16 = sphi %s1074_s16, %s17_s16   ;;  %s1027_s15 = sphi %s1072_s15, %s1344_s15   ;;  %s1023_s14 = sphi %s1070_s14, %s1343_s14   ;;  %s1019_s13 = sphi %s1068_s13, %s1342_s13   ;;  %s1015_s12 = sphi %s1066_s12, %s1341_s12   ;;  %s1011_s11 = sphi %s1064_s11, %s1340_s11   ;;  %s1007_s10 = sphi %s1062_s10, %s1339_s10   ;;  %s1003_s9 = sphi %s1060_s9, %s1338_s9   ;;  %s999_s8 = sphi %s1058_s8, %s1337_s8   ;;  %s995_s7 = sphi %s1056_s7, %s1336_s7   ;;  %s991_s6 = sphi %s1054_s6, %s1335_s6  }
   0xa   : > { %s26_s19 = sadd.s32 1, %s1023_s14  ;;  %s29_s20 = sadd.s32 1, %s1027_s15 }
   0xb   : > { %p27_p0 = scmp.ge.s32.totalorder %s26_s19, 2  ;;  %s38_s21 = sadd.s32 1, %s1011_s11 }
   0xc   : > { %p45_p1 = scmp.ne.s32.totalorder %s1011_s11, %s1007_s10  ;;  %p46_p2 = scmp.eq.s32.totalorder %s1031_s16, 0 }
   0xd   : > { %s1346_s19 = smov (%p27_p0, %s26_s19), 0  ;;  %s1348_s20 = smov (!%p27_p0, %s29_s20), %s1027_s15 }
   0xe   : > { %s34_s22 = ssub.s32 %s1023_s14, %s1346_s19  ;;  %p1120_p3 = por %p46_p2, %p45_p1 }
   0xf   : > { %p31_p4 = scmp.ge.s32.totalorder %s1348_s20, 2  ;;  %p51_p5 = scmp.ne.s32.totalorder %s1007_s10, %s1003_s9 }
  0x10   : > { %p52_p6 = scmp.eq.s32.totalorder %s676_s17, 0  ;;  %s64_s24 = sadd.s32 1, %s999_s8 }
  0x11   : > { %s1350_s20 = smov (%p31_p4, %s1348_s20), 0  ;;  %p74_p8 = scmp.ne.s32.totalorder %s999_s8, %s995_s7 }
  0x12   : > { %p1128_p7 = por %p52_p6, %p51_p5  ;;  %s33_s26 = ssub.s32 %s1027_s15, %s1350_s20 }
  0x13   : > { %p75_p9 = scmp.eq.s32.totalorder %s676_s17, 3  ;;  %s35_s27 = sor.u32 %s34_s22, %s33_s26 }
  0x14   : > { %p62_p10 = scmp.eq.s32.totalorder %s33_s26, 0  ;;  %p36_p11 = scmp.eq.s32.totalorder %s35_s27, 0 }
  0x15   : > { %p1136_p12 = por %p75_p9, %p74_p8  ;;  %p80_p13 = scmp.ne.s32.totalorder %s995_s7, %s991_s6 }
  0x16   : > { %s1141_s29 = scalar_select %p62_p10, %s999_s8, %s64_s24  }
  0x17   : > { %s1330_s28 = scalar_select %p1136_p12, 1, 0 }
  0x18   : > { %s1144_s30 = scalar_select %p36_p11, %s1011_s11, %s38_s21  }
  0x19   : > { %p81_p0 = scmp.eq.s32.totalorder %s677_s18, 3  ;;  %p780_p1 = scmp.lt.s32.totalorder %s1031_s16, 4 }
  0x1a   : > { %s101_s3 = sand.u32 1, %s1011_s11   ;;  %s702_s5 = sshll.u32 %s1027_s15, 4 }
  0x1b   : > { %p1149_p2 = por %p81_p0, %p80_p13  ;;  %s680_s4 = sshll.u32 %s101_s3, 5 }
  0x1c   : > { %s111_s9 = sadd.s32 %s1023_s14, %s702_s5  ;;  %s105_s17 = scalar_lea.vmem [#allocation3], %s680_s4 }
  0x1d   : > { %s1331_s2 = scalar_select %p1149_p2, 1, 0 }
  0x1e   : > { %s114_s22 = sshll.u32 %s105_s17, 4  ;;  %s683_s26 = sshll.u32 %s111_s9, 6  ;;  %s1156_s22 = int_to_ptr.vmem [resolvable:$true] %s114_s22 }
  0x1f   : > { %s1161_s21 = scalar_lea.hbm %s1325_s0, %s683_s26  ;;  %p1165_p4 = pnand %p780_p1, %p1120_p3 }
  0x20   : > { %s1169_s4 = scalar_lea.sflag [#allocation4], %s101_s3  ;;  %s879_s5 = scalar_lea.hbm %s1161_s21, 512 }
  0x21   : > { %p880_p5 = scmp.ne.s32.totalorder %s1161_s21, %s879_s5  ;;  %p881_p6 = pneg %p1165_p4 }
  0x22   : > { %s884_s17 = scalar_lea.hbm %s1325_s0, 2048  ;;  %p885_p3 = scmp.lt.u32.totalorder %s1161_s21, %s1325_s0 }
  0x23   : > { %p882_p8 = pnand %p881_p6, %p880_p5  ;;  %p886_p10 = scmp.lt.u32.totalorder %s884_s17, %s879_s5 }
  0x24   : > { %p888_p13 = scmp.lt.u32.totalorder %s879_s5, %s1161_s21 }
  0x25   : > { %p883_p9 = pneg %p882_p8  ;;  %p887_p11 = por %p886_p10, %p885_p3 }
  0x27   : > { %p889_p0 = por %p888_p13, %p887_p11 }
  0x29   : > { %p890_p1 = pnand %p889_p0, %p883_p9 }
  0x2b   : > { %893 = shalt.err (!%p890_p1)
}
  0x2c   : > { %s894_s3 = scalar_lea.vmem %s1156_s22, 512  ;;  %s1033_s27 = smov [#allocation3]  }
  0x2d   : > { %p895_p5 = scmp.ne.s32.totalorder %s1156_s22, %s894_s3  ;;  %s899_s23 = sshll.u32 %s1033_s27, 4  ;;  %s900_s23 = int_to_ptr.vmem [resolvable:$false] %s899_s23 }
  0x2e   : > { %s901_s9 = scalar_lea.vmem %s900_s23, 1024  ;;  %p902_p12 = scmp.lt.s32.totalorder %s1156_s22, %s900_s23 }
  0x2f   : > { %p897_p8 = pnand %p895_p5, %p881_p6  ;;  %p903_p3 = scmp.lt.s32.totalorder %s901_s9, %s894_s3 }
  0x31   : > { %p898_p2 = pneg %p897_p8  ;;  %p904_p10 = por %p903_p3, %p902_p12 }
  0x33   : > { %p905_p11 = pnand %p904_p10, %p898_p2 }
  0x35   : > { %908 = shalt.err (!%p905_p11)
}
  0x36   : > { %s1034_s5 = smov 128   ;;  %s1035_s17 = smov 64  }
  0x37   : > { %s1036_s26 = smov 4   ;;  %p684_p6 = scmp.ge.s32.totalorder %s1031_s16, 1 }
  0x38   : > { %775 = dma.hbm_to_vmem [thread:$0]  (!%p1165_p4), %s1161_s21, 512, %s1156_s22, %s1169_s4, %s1034_s5, %s1035_s17, %s1036_s26  }
  0x39   : > { %p122_p9 = scmp.lt.s32.totalorder %s1031_s16, 5 }
  0x3b   : > { %p123_p13 = pnand %p684_p6, %p122_p9 }
  0x3c   : > { %s128_s24 = sand.u32 (!%p123_p13), 1, %s1007_s10  }
  0x3d   : > { %126 = sbr.rel (%p123_p13) target bundleno = 358 (0x166), region = 24  ;;  %s685_s3 = sshll.u32 (!%p123_p13), %s128_s24, 5 }
  0x3e   : > { %s129_s27 = scalar_lea.sflag (!%p123_p13), [#allocation4], %s128_s24  ;;  %s1200_s23 = scalar_lea.vmem (!%p123_p13), [#allocation3], %s685_s3 }
  0x44   : > { %982 = dma.done.wait (%p1128_p7), %s129_s27, 512  }
  0x45   : > { %984 = vsyncadd (%p1128_p7), %s129_s27, 4294966784  ;;  %s148_s18 = sand.u32 1, %s995_s7   ;;  %p687_p12 = scmp.ne.s32.totalorder %s1015_s12, 0 }
  0x46   : > { %s686_s22 = sshll.u32 %s148_s18, 3  ;;  %v1037_v0 = vmov (!%p687_p12), 0.0  }
  0x47   : > { %s1209_s21 = scalar_lea.vmem [#allocation6], %s686_s22  ;;  %158 = sbr.rel (%p687_p12) target bundleno = 78 (0x4e), region = 32  ;;  %159 = vst [vmem:[#allocation2] sm:$0x1] (!%p687_p12), %v1037_v0  ;;  %160 = vst [vmem:[#allocation2 + $0x1] sm:$0x1] (!%p687_p12), %v1037_v0 }
  0x48   : > { %161 = vst [vmem:[#allocation2 + $0x2] sm:$0x1] (!%p687_p12), %v1037_v0  ;;  %162 = vst [vmem:[#allocation2 + $0x3] sm:$0x1] (!%p687_p12), %v1037_v0 }
  0x49   : > { %163 = vst [vmem:[#allocation2 + $0x4] sm:$0x1] (!%p687_p12), %v1037_v0  ;;  %164 = vst [vmem:[#allocation2 + $0x5] sm:$0x1] (!%p687_p12), %v1037_v0 }
  0x4a   : > { %165 = vst [vmem:[#allocation2 + $0x6] sm:$0x1] (!%p687_p12), %v1037_v0  ;;  %166 = vst [vmem:[#allocation2 + $0x7] sm:$0x1] (!%p687_p12), %v1037_v0 }
  0x4e PF: > { %v175_v1 = vld [vmem:[%s1200_s23] sm:$0xf]  ;;  %vm187_vm0 = vcmask 1043456   ;;  %v176_v2 = vld [vmem:[%s1200_s23 + $0x4] sm:$0xf]  ;;  %v1038_v3 = vmov 0.0  }
  0x4f   : > { %720 = vmatprep.subr.bf16.mxu0 %v1038_v3  ;;  %726 = vmatprep.subr.bf16.mxu1 %v1038_v3  ;;  %v189_v4 = vsel %vm187_vm0, %v175_v1, 0  ;;  %v232_v5 = vsel %vm187_vm0, %v176_v2, 0  ;;  %v177_v6 = vld [vmem:[%s1200_s23 + $0x8] sm:$0xf]  ;;  %vm183_vm1 = vcmask 64512   ;;  %vm1039_vm2 = vmmov 0  }
  0x50   : > { %721 = vmatpush3.bf16.msra.mxu0 %v189_v4  ;;  %727 = vmatpush3.bf16.msra.mxu1 %v232_v5  ;;  %v178_v7 = vld [vmem:[%s1200_s23 + $0xc] sm:$0xf]  ;;  %v275_v8 = vsel %vm187_vm0, %v177_v6, 0  ;;  %v1040_v10 = vmov 1065369472   ;;  %p696_p7 = scmp.ne.s32.totalorder %s1015_s12, 1 }
  0x51   : > { %722 = vmatprep.mubr.msk.bf16.mxu0 %vm1039_vm2, %v1038_v3  ;;  %728 = vmatprep.mubr.msk.bf16.mxu1 %vm1039_vm2, %v1038_v3  ;;  %v318_v9 = vsel %vm187_vm0, %v178_v7, 0  ;;  %v179_v11 = vld [vmem:[%s1200_s23 + $0x10] sm:$0xf]  ;;  %v180_v12 = vld [vmem:[%s1200_s23 + $0x14] sm:$0xf] }
  0x52   : > { %732 = vmatprep.subr.bf16.mxu0 %v1038_v3  ;;  %738 = vmatprep.subr.bf16.mxu1 %v1038_v3  ;;  %v361_v13 = vsel %vm187_vm0, %v179_v11, 0  ;;  %v404_v14 = vsel %vm187_vm0, %v180_v12, 0  ;;  %v181_v15 = vld [vmem:[%s1200_s23 + $0x18] sm:$0xf]  ;;  %v182_v16 = vld [vmem:[%s1200_s23 + $0x1c] sm:$0xf] }
  0x53   : > { %723 = vmatmul.mubr.msk.bf16.vlgmr.msra.gmra.mrb[0].mxu0 %vm183_vm1, %v1040_v10  ;;  %729 = vmatmul.mubr.msk.bf16.vlgmr.msra.gmra.mrb[0].mxu1 %vm183_vm1, %v1040_v10  ;;  %v447_v17 = vsel %vm187_vm0, %v181_v15, 0  ;;  %v490_v18 = vsel %vm187_vm0, %v182_v16, 0  ;;  %v167_v19 = vld [vmem:[#allocation2] sm:$0x1]  ;;  %v168_v20 = vld [vmem:[#allocation2 + $0x1] sm:$0x1] }
  0x54   : > { %733 = vmatpush3.bf16.msra.mxu0 %v275_v8  ;;  %739 = vmatpush3.bf16.msra.mxu1 %v318_v9  ;;  %v169_v31 = vld [vmem:[#allocation2 + $0x2] sm:$0x1]  ;;  %v170_v32 = vld [vmem:[#allocation2 + $0x3] sm:$0x1]  ;;  %v171_v43 = vld [vmem:[#allocation2 + $0x4] sm:$0x1] }
  0x55   : > { %734 = vmatprep.mubr.msk.bf16.mxu0 %vm1039_vm2, %v1038_v3  ;;  %740 = vmatprep.mubr.msk.bf16.mxu1 %vm1039_vm2, %v1038_v3  ;;  %v172_v44 = vld [vmem:[#allocation2 + $0x5] sm:$0x1]  ;;  %v173_v55 = vld [vmem:[#allocation2 + $0x6] sm:$0x1]  ;;  %v174_v56 = vld [vmem:[#allocation2 + $0x7] sm:$0x1] }
  0x56   : > { %744 = vmatprep.subr.bf16.mxu0 %v1038_v3  ;;  %750 = vmatprep.subr.bf16.mxu1 %v1038_v3 }
  0x5b   : > { %735 = vmatmul.mubr.msk.bf16.vlgmr.msra.gmra.mrb[4].mxu0 %vm183_vm1, %v1040_v10  ;;  %741 = vmatmul.mubr.msk.bf16.vlgmr.msra.gmra.mrb[4].mxu1 %vm183_vm1, %v1040_v10 }
  0x5c   : > { %745 = vmatpush3.bf16.msra.mxu0 %v361_v13  ;;  %751 = vmatpush3.bf16.msra.mxu1 %v404_v14 }
  0x5d   : > { %746 = vmatprep.mubr.msk.bf16.mxu0 %vm1039_vm2, %v1038_v3  ;;  %752 = vmatprep.mubr.msk.bf16.mxu1 %vm1039_vm2, %v1038_v3 }
  0x5e   : > { %756 = vmatprep.subr.bf16.mxu0 %v1038_v3  ;;  %762 = vmatprep.subr.bf16.mxu1 %v1038_v3 }
  0x63   : > { %747 = vmatmul.mubr.msk.bf16.vlgmr.msra.gmra.mrb[8].mxu0 %vm183_vm1, %v1040_v10  ;;  %753 = vmatmul.mubr.msk.bf16.vlgmr.msra.gmra.mrb[8].mxu1 %vm183_vm1, %v1040_v10 }
  0x64   : > { %757 = vmatpush3.bf16.msra.mxu0 %v447_v17  ;;  %763 = vmatpush3.bf16.msra.mxu1 %v490_v18 }
  0x65   : > { %758 = vmatprep.mubr.msk.bf16.mxu0 %vm1039_vm2, %v1038_v3  ;;  %764 = vmatprep.mubr.msk.bf16.mxu1 %vm1039_vm2, %v1038_v3 }
  0x6b   : > { %759 = vmatmul.mubr.msk.bf16.vlgmr.msra.gmra.mrb[12].mxu0 %vm183_vm1, %v1040_v10  ;;  %765 = vmatmul.mubr.msk.bf16.vlgmr.msra.gmra.mrb[12].mxu1 %vm183_vm1, %v1040_v10 }
 0x126   : > { %v225_v21 = vpop.f32.mrb[0].mxu0  ;;  %v268_v22 = vpop.f32.mrb[0].mxu1 }
 0x127   : > { %v532_v23 = vadd.f32 %v225_v21, %v167_v19  ;;  %v533_v24 = vadd.f32 %v268_v22, %v168_v20  ;;  %v724_v25 = vpop.f32.mrb[1].mxu0  ;;  %v730_v26 = vpop.f32.mrb[1].mxu1 }
 0x128   : > { %v228_v27 = vpop.f32.mrb[2].mxu0  ;;  %v271_v28 = vpop.f32.mrb[2].mxu1 }
 0x129   : > { %540 = vst [vmem:[#allocation2] sm:$0x1] %v532_v23  ;;  %541 = vst [vmem:[#allocation2 + $0x1] sm:$0x1] %v533_v24  ;;  %v725_v29 = vpop.f32.mrb[3].mxu0  ;;  %v731_v30 = vpop.f32.mrb[3].mxu1 }
 0x12e   : > { %v311_v33 = vpop.f32.mrb[4].mxu0  ;;  %v354_v34 = vpop.f32.mrb[4].mxu1 }
 0x12f   : > { %v534_v35 = vadd.f32 %v311_v33, %v169_v31  ;;  %v535_v36 = vadd.f32 %v354_v34, %v170_v32  ;;  %v736_v37 = vpop.f32.mrb[5].mxu0  ;;  %v742_v38 = vpop.f32.mrb[5].mxu1 }
 0x130   : > { %v314_v39 = vpop.f32.mrb[6].mxu0  ;;  %v357_v40 = vpop.f32.mrb[6].mxu1  ;;  %v552_v3 = vld [vmem:[#allocation2] sm:$0x1] (!%p696_p7)  ;;  %v553_v4 = vld [vmem:[#allocation2 + $0x1] sm:$0x1] (!%p696_p7) }
 0x131   : > { %542 = vst [vmem:[#allocation2 + $0x2] sm:$0x1] %v534_v35  ;;  %543 = vst [vmem:[#allocation2 + $0x3] sm:$0x1] %v535_v36  ;;  %v737_v41 = vpop.f32.mrb[7].mxu0  ;;  %v743_v42 = vpop.f32.mrb[7].mxu1 }
 0x132   : > { %v560_v6 = vmul.f32 (!%p696_p7), 0.0625, %v552_v3  ;;  %v561_v7 = vmul.f32 (!%p696_p7), 0.0625, %v553_v4 }
 0x134   : > { %568 = vst [vmem:[%s1209_s21] sm:$0x1] (!%p696_p7), %v560_v6  ;;  %569 = vst [vmem:[%s1209_s21 + $0x1] sm:$0x1] (!%p696_p7), %v561_v7 }
 0x136   : > { %v397_v45 = vpop.f32.mrb[8].mxu0  ;;  %v440_v46 = vpop.f32.mrb[8].mxu1 }
 0x137   : > { %v536_v47 = vadd.f32 %v397_v45, %v171_v43  ;;  %v537_v48 = vadd.f32 %v440_v46, %v172_v44  ;;  %v748_v49 = vpop.f32.mrb[9].mxu0  ;;  %v754_v50 = vpop.f32.mrb[9].mxu1 }
 0x138   : > { %v400_v51 = vpop.f32.mrb[10].mxu0  ;;  %v443_v52 = vpop.f32.mrb[10].mxu1  ;;  %v554_v5 = vld [vmem:[#allocation2 + $0x2] sm:$0x1] (!%p696_p7)  ;;  %v555_v9 = vld [vmem:[#allocation2 + $0x3] sm:$0x1] (!%p696_p7) }
 0x139   : > { %544 = vst [vmem:[#allocation2 + $0x4] sm:$0x1] %v536_v47  ;;  %545 = vst [vmem:[#allocation2 + $0x5] sm:$0x1] %v537_v48  ;;  %v749_v53 = vpop.f32.mrb[11].mxu0  ;;  %v755_v54 = vpop.f32.mrb[11].mxu1 }
 0x13a   : > { %v562_v8 = vmul.f32 (!%p696_p7), 0.0625, %v554_v5  ;;  %v563_v10 = vmul.f32 (!%p696_p7), 0.0625, %v555_v9 }
 0x13b   : > { %551 = sbr.rel (%p696_p7) target bundleno = 332 (0x14c), region = 36 }
 0x13c   : > { %570 = vst [vmem:[%s1209_s21 + $0x2] sm:$0x1] (!%p696_p7), %v562_v8  ;;  %571 = vst [vmem:[%s1209_s21 + $0x3] sm:$0x1] (!%p696_p7), %v563_v10 }
 0x13e   : > { %v483_v57 = vpop.f32.mrb[12].mxu0  ;;  %v526_v58 = vpop.f32.mrb[12].mxu1 }
 0x13f   : > { %v538_v59 = vadd.f32 %v483_v57, %v173_v55  ;;  %v539_v60 = vadd.f32 %v526_v58, %v174_v56  ;;  %v760_v61 = vpop.f32.mrb[13].mxu0  ;;  %v766_v62 = vpop.f32.mrb[13].mxu1 }
 0x140   : > { %v486_v63 = vpop.f32.mrb[14].mxu0  ;;  %v529_v0 = vpop.f32.mrb[14].mxu1  ;;  %v556_v11 = vld [vmem:[#allocation2 + $0x4] sm:$0x1] (!%p696_p7)  ;;  %v557_v12 = vld [vmem:[#allocation2 + $0x5] sm:$0x1] (!%p696_p7) }
 0x141   : > { %546 = vst [vmem:[#allocation2 + $0x6] sm:$0x1] %v538_v59  ;;  %547 = vst [vmem:[#allocation2 + $0x7] sm:$0x1] %v539_v60  ;;  %v761_v1 = vpop.f32.mrb[15].mxu0  ;;  %v767_v2 = vpop.f32.mrb[15].mxu1 }
 0x142   : > { %v564_v13 = vmul.f32 0.0625, %v556_v11  ;;  %v565_v14 = vmul.f32 0.0625, %v557_v12 }
 0x144   : > { %572 = vst [vmem:[%s1209_s21 + $0x4] sm:$0x1] %v564_v13  ;;  %573 = vst [vmem:[%s1209_s21 + $0x5] sm:$0x1] %v565_v14 }
 0x148   : > { %v558_v15 = vld [vmem:[#allocation2 + $0x6] sm:$0x1]  ;;  %v559_v16 = vld [vmem:[#allocation2 + $0x7] sm:$0x1] }
 0x149   : > { %v566_v17 = vmul.f32 0.0625, %v558_v15  ;;  %v567_v18 = vmul.f32 0.0625, %v559_v16 }
 0x14b   : > { %574 = vst [vmem:[%s1209_s21 + $0x6] sm:$0x1] %v566_v17  ;;  %575 = vst [vmem:[%s1209_s21 + $0x7] sm:$0x1] %v567_v18 }
 0x14c PF: > { %s703_s12 = sshll.u32 %s1019_s13, 7  ;;  %s590_s5 = sshll.u32 %s1209_s21, 4  ;;  %s1260_s5 = int_to_ptr.vmem [resolvable:$true] %s590_s5 }
 0x14d   : > { %s1257_s9 = scalar_lea.hbm %s1326_s1, %s703_s12  ;;  %s1264_s17 = scalar_lea.sflag [#allocation5], %s148_s18 }
 0x14e   : > { %s909_s26 = scalar_lea.vmem %s1260_s5, 128  ;;  %p1333_p4 = scmp.ne.s32.totalorder %s1330_s28, 0 }
 0x14f   : > { %p910_p2 = scmp.ne.s32.totalorder %s1260_s5, %s909_s26  ;;  %s1041_s13 = smov [#allocation6]  }
 0x150   : > { %s913_s24 = sshll.u32 %s1041_s13, 4  ;;  %s914_s24 = int_to_ptr.vmem [resolvable:$false] %s913_s24 }
 0x151   : > { %p911_p0 = pnand %p910_p2, %p1333_p4  ;;  %s915_s3 = scalar_lea.vmem %s914_s24, 256 }
 0x152   : > { %p916_p5 = scmp.lt.s32.totalorder %s1260_s5, %s914_s24  ;;  %p917_p8 = scmp.lt.s32.totalorder %s915_s3, %s909_s26 }
 0x153   : > { %p912_p1 = pneg %p911_p0 }
 0x154   : > { %p918_p3 = por %p917_p8, %p916_p5 }
 0x156   : > { %p919_p10 = pnand %p918_p3, %p912_p1 }
 0x158   : > { %922 = shalt.err (!%p919_p10)
}
 0x159   : > { %s923_s27 = scalar_lea.hbm %s1257_s9, 128  ;;  %s927_s22 = scalar_lea.hbm %s1326_s1, 256 }
 0x15a   : > { %p924_p11 = scmp.ne.s32.totalorder %s1257_s9, %s923_s27  ;;  %p928_p13 = scmp.lt.u32.totalorder %s1257_s9, %s1326_s1 }
 0x15b   : > { %p929_p12 = scmp.lt.u32.totalorder %s927_s22, %s923_s27  ;;  %p931_p2 = scmp.lt.u32.totalorder %s923_s27, %s1257_s9 }
 0x15c   : > { %p925_p6 = pnand %p924_p11, %p1333_p4 }
 0x15d   : > { %p930_p7 = por %p929_p12, %p928_p13 }
 0x15e   : > { %p926_p9 = pneg %p925_p6 }
 0x15f   : > { %p932_p0 = por %p931_p2, %p930_p7 }
 0x161   : > { %p933_p1 = pnand %p932_p0, %p926_p9 }
 0x163   : > { %936 = shalt.err (!%p933_p1)
}
 0x164   : > { %s1042_s25 = smov 16   ;;  %s1043_s4 = smov 1  }
 0x165   : > { %770 = dma.vmem_to_hbm [thread:$0]  (%p1333_p4), %s1260_s5, 128, %s1257_s9, %s1264_s17, %s1042_s25, %s1042_s25, %s1043_s4  }
 0x166 PF: > { %p781_p5 = scmp.ge.s32.totalorder %s1031_s16, 2  ;;  %s605_s26 = sand.u32 1, %s991_s6  }
 0x167   : > { %p1334_p8 = scmp.ne.s32.totalorder %s1331_s2, 0  ;;  %s606_s13 = scalar_lea.sflag [#allocation5], %s605_s26 }
 0x169   : > { %p777_p3 = pnand %p781_p5, %p1334_p8 }
 0x16b   : > { %986 = dma.done.wait (!%p777_p3), %s606_s13, 128  }
 0x16c   : > { %988 = vsyncadd (!%p777_p3), %s606_s13, 4294967168  ;;  %s17_s16 = sadd.s32 1, %s1031_s16   ;;  %s1335_s6 = smov %s995_s7 }
 0x16d   : > { %p14_p10 = scmp.ge.s32.totalorder %s17_s16, 6   ;;  %s1336_s7 = smov %s999_s8 }
 0x16e   : > { %s1337_s8 = smov %s1141_s29  ;;  %s1338_s9 = smov %s1007_s10 }
 0x16f   : > { %s1339_s10 = smov %s1011_s11  ;;  %s1340_s11 = smov %s1144_s30 }
 0x170   : > { %s1341_s12 = smov %s1023_s14  ;;  %s1342_s13 = smov %s1027_s15 }
 0x171   : > { %s1343_s14 = smov %s1346_s19  ;;  %s1344_s15 = smov %s1350_s20 }
 0x172   :  { %16 = sbr.rel (!%p14_p10) target bundleno = 9 (0x9), region = 77 }
 0x179   :  { %611 = vsyncpa [#allocation4], 1 }
 0x17a   :  { %613 = vsyncpa [#allocation4 + $0x1], 1 }
 0x17b   :  { %614 = vsyncpa [#allocation5], 1 }
 0x17c   :  { %616 = vsyncpa [#allocation5 + $0x1], 1 }

// kernel: tpu_custom_call.1
= control target key start
LH: loop header
LB: loop body
LE: loop exit
PB: predicated region body
PF: predicated region fallthrough
CT: control target
= control target key end

     0   :  { %6 = vsyncpa [#allocation4], 0  ;;  %s937_s0 = inlined_call_operand.hbm [shape: bf16[16,16,128], index: 0, kind: input, shape index: {}]   ;;  %s938_s1 = inlined_call_operand.hbm [shape: f32[16,1,128], index: 1, kind: output, shape index: {}]  }
   0x1   :  { %8 = vsyncpa [#allocation4 + $0x1], 0 }
   0x2   :  { %9 = vsyncpa [#allocation5], 0 }
   0x3   :  { %11 = vsyncpa [#allocation5 + $0x1], 0  ;;  %s700_s6 = smov 0   ;;  %s702_s7 = smov 0  }
   0x4   :  { %s704_s8 = smov 0   ;;  %s706_s9 = smov 0  }
   0x5   :  { %s708_s10 = smov 0   ;;  %s710_s11 = smov 0  }
   0x6   :  { %s712_s12 = smov 0   ;;  %s714_s13 = smov 0  }
   0x7   :  { %s716_s14 = smov 0   ;;  %s718_s15 = smov 0  }
   0x8   :  { %s720_s16 = smov 0  }
   0x9 LB: > { %s381_s17 = sadd.s32 4294967295, %s680_s16   ;;  %s382_s18 = sadd.s32 4294967294, %s680_s16   ;;  %s680_s16 = sphi %s720_s16, %s17_s16   ;;  %s676_s15 = sphi %s718_s15, %s956_s15   ;;  %s672_s14 = sphi %s716_s14, %s955_s14   ;;  %s668_s13 = sphi %s714_s13, %s954_s13   ;;  %s664_s12 = sphi %s712_s12, %s953_s12   ;;  %s660_s11 = sphi %s710_s11, %s952_s11   ;;  %s656_s10 = sphi %s708_s10, %s951_s10   ;;  %s652_s9 = sphi %s706_s9, %s950_s9   ;;  %s648_s8 = sphi %s704_s8, %s949_s8   ;;  %s644_s7 = sphi %s702_s7, %s948_s7   ;;  %s640_s6 = sphi %s700_s6, %s947_s6  }
   0xa   : > { %s26_s19 = sadd.s32 1, %s672_s14  ;;  %s29_s20 = sadd.s32 1, %s676_s15 }
   0xb   : > { %p27_p0 = scmp.ge.s32.totalorder %s26_s19, 2  ;;  %s38_s21 = sadd.s32 1, %s660_s11 }
   0xc   : > { %p45_p1 = scmp.ne.s32.totalorder %s660_s11, %s656_s10  ;;  %p46_p2 = scmp.eq.s32.totalorder %s680_s16, 0 }
   0xd   : > { %s958_s19 = smov (%p27_p0, %s26_s19), 0  ;;  %s960_s20 = smov (!%p27_p0, %s29_s20), %s676_s15 }
   0xe   : > { %s34_s22 = ssub.s32 %s672_s14, %s958_s19  ;;  %p766_p3 = por %p46_p2, %p45_p1 }
   0xf   : > { %p31_p4 = scmp.ge.s32.totalorder %s960_s20, 2  ;;  %p51_p5 = scmp.ne.s32.totalorder %s656_s10, %s652_s9 }
  0x10   : > { %p52_p6 = scmp.eq.s32.totalorder %s381_s17, 0  ;;  %s64_s24 = sadd.s32 1, %s648_s8 }
  0x11   : > { %s962_s20 = smov (%p31_p4, %s960_s20), 0  ;;  %p74_p8 = scmp.ne.s32.totalorder %s648_s8, %s644_s7 }
  0x12   : > { %p774_p7 = por %p52_p6, %p51_p5  ;;  %s33_s26 = ssub.s32 %s676_s15, %s962_s20 }
  0x13   : > { %p75_p9 = scmp.eq.s32.totalorder %s381_s17, 3  ;;  %s35_s27 = sor.u32 %s34_s22, %s33_s26 }
  0x14   : > { %p62_p10 = scmp.eq.s32.totalorder %s33_s26, 0  ;;  %p36_p11 = scmp.eq.s32.totalorder %s35_s27, 0 }
  0x15   : > { %p782_p12 = por %p75_p9, %p74_p8  ;;  %p80_p13 = scmp.ne.s32.totalorder %s644_s7, %s640_s6 }
  0x16   : > { %s787_s29 = scalar_select %p62_p10, %s648_s8, %s64_s24  }
  0x17   : > { %s942_s28 = scalar_select %p782_p12, 1, 0 }
  0x18   : > { %s790_s30 = scalar_select %p36_p11, %s660_s11, %s38_s21  }
  0x19   : > { %p81_p0 = scmp.eq.s32.totalorder %s382_s18, 3  ;;  %p432_p1 = scmp.lt.s32.totalorder %s680_s16, 4 }
  0x1a   : > { %s101_s3 = sand.u32 1, %s660_s11   ;;  %s399_s5 = sshll.u32 %s676_s15, 4 }
  0x1b   : > { %p795_p2 = por %p81_p0, %p80_p13  ;;  %s385_s4 = sshll.u32 %s101_s3, 5 }
  0x1c   : > { %s111_s9 = sadd.s32 %s672_s14, %s399_s5  ;;  %s105_s17 = scalar_lea.vmem [#allocation3], %s385_s4 }
  0x1d   : > { %s943_s2 = scalar_select %p795_p2, 1, 0 }
  0x1e   : > { %s114_s22 = sshll.u32 %s105_s17, 4  ;;  %s388_s26 = sshll.u32 %s111_s9, 6  ;;  %s802_s22 = int_to_ptr.vmem [resolvable:$true] %s114_s22 }
  0x1f   : > { %s807_s21 = scalar_lea.hbm %s937_s0, %s388_s26  ;;  %p811_p4 = pnand %p432_p1, %p766_p3 }
  0x20   : > { %s815_s4 = scalar_lea.sflag [#allocation4], %s101_s3  ;;  %s528_s5 = scalar_lea.hbm %s807_s21, 512 }
  0x21   : > { %p529_p5 = scmp.ne.s32.totalorder %s807_s21, %s528_s5  ;;  %p530_p6 = pneg %p811_p4 }
  0x22   : > { %s533_s17 = scalar_lea.hbm %s937_s0, 2048  ;;  %p534_p3 = scmp.lt.u32.totalorder %s807_s21, %s937_s0 }
  0x23   : > { %p531_p8 = pnand %p530_p6, %p529_p5  ;;  %p535_p10 = scmp.lt.u32.totalorder %s533_s17, %s528_s5 }
  0x24   : > { %p537_p13 = scmp.lt.u32.totalorder %s528_s5, %s807_s21 }
  0x25   : > { %p532_p9 = pneg %p531_p8  ;;  %p536_p11 = por %p535_p10, %p534_p3 }
  0x27   : > { %p538_p0 = por %p537_p13, %p536_p11 }
  0x29   : > { %p539_p1 = pnand %p538_p0, %p532_p9 }
  0x2b   : > { %542 = shalt.err (!%p539_p1)
}
  0x2c   : > { %s543_s3 = scalar_lea.vmem %s802_s22, 512  ;;  %s682_s27 = smov [#allocation3]  }
  0x2d   : > { %p544_p5 = scmp.ne.s32.totalorder %s802_s22, %s543_s3  ;;  %s548_s23 = sshll.u32 %s682_s27, 4  ;;  %s549_s23 = int_to_ptr.vmem [resolvable:$false] %s548_s23 }
  0x2e   : > { %s550_s9 = scalar_lea.vmem %s549_s23, 1024  ;;  %p551_p12 = scmp.lt.s32.totalorder %s802_s22, %s549_s23 }
  0x2f   : > { %p546_p8 = pnand %p544_p5, %p530_p6  ;;  %p552_p3 = scmp.lt.s32.totalorder %s550_s9, %s543_s3 }
  0x31   : > { %p547_p2 = pneg %p546_p8  ;;  %p553_p10 = por %p552_p3, %p551_p12 }
  0x33   : > { %p554_p11 = pnand %p553_p10, %p547_p2 }
  0x35   : > { %557 = shalt.err (!%p554_p11)
}
  0x36   : > { %s683_s5 = smov 128   ;;  %s684_s17 = smov 64  }
  0x37   : > { %s685_s26 = smov 4   ;;  %p389_p6 = scmp.ge.s32.totalorder %s680_s16, 1 }
  0x38   : > { %427 = dma.hbm_to_vmem [thread:$0]  (!%p811_p4), %s807_s21, 512, %s802_s22, %s815_s4, %s683_s5, %s684_s17, %s685_s26  }
  0x39   : > { %p122_p9 = scmp.lt.s32.totalorder %s680_s16, 5 }
  0x3b   : > { %p123_p13 = pnand %p389_p6, %p122_p9 }
  0x3c   : > { %s128_s24 = sand.u32 (!%p123_p13), 1, %s656_s10  }
  0x3d   : > { %126 = sbr.rel (%p123_p13) target bundleno = 136 (0x88), region = 24  ;;  %s390_s3 = sshll.u32 (!%p123_p13), %s128_s24, 5 }
  0x3e   : > { %s129_s27 = scalar_lea.sflag (!%p123_p13), [#allocation4], %s128_s24  ;;  %s132_s23 = scalar_lea.vmem (!%p123_p13), [#allocation3], %s390_s3 }
  0x44   : > { %631 = dma.done.wait (%p774_p7), %s129_s27, 512  }
  0x45   : > { %633 = vsyncadd (%p774_p7), %s129_s27, 4294966784  ;;  %s148_s9 = sand.u32 1, %s644_s7   ;;  %p392_p12 = scmp.ne.s32.totalorder %s664_s12, 0 }
  0x46   : > { %s391_s22 = sshll.u32 %s148_s9, 3  ;;  %v686_v0 = vmov (!%p392_p12), 0.0  }
  0x47   : > { %s853_s21 = scalar_lea.vmem [#allocation6], %s391_s22  ;;  %156 = sbr.rel (%p392_p12) target bundleno = 78 (0x4e), region = 32  ;;  %157 = vst [vmem:[#allocation2] sm:$0x1] (!%p392_p12), %v686_v0  ;;  %158 = vst [vmem:[#allocation2 + $0x1] sm:$0x1] (!%p392_p12), %v686_v0 }
  0x48   : > { %159 = vst [vmem:[#allocation2 + $0x2] sm:$0x1] (!%p392_p12), %v686_v0  ;;  %160 = vst [vmem:[#allocation2 + $0x3] sm:$0x1] (!%p392_p12), %v686_v0 }
  0x49   : > { %161 = vst [vmem:[#allocation2 + $0x4] sm:$0x1] (!%p392_p12), %v686_v0  ;;  %162 = vst [vmem:[#allocation2 + $0x5] sm:$0x1] (!%p392_p12), %v686_v0 }
  0x4a   : > { %163 = vst [vmem:[#allocation2 + $0x6] sm:$0x1] (!%p392_p12), %v686_v0  ;;  %164 = vst [vmem:[#allocation2 + $0x7] sm:$0x1] (!%p392_p12), %v686_v0 }
  0x4e PF: > { %v402_v1 = vld [vmem:[%s132_s23] sm:$0xff]   ;;  %v417_v4 = vld [vmem:[%s132_s23 + $0x8] sm:$0xff]   ;;  %v418_v7 = vld [vmem:[%s132_s23 + $0x10] sm:$0xff]   ;;  %p393_p7 = scmp.ne.s32.totalorder %s664_s12, 1 }
  0x4f   : > { %v403_v2 = vunpack.c.l.bf16 %v402_v1  ;;  %v404_v3 = vunpack.c.h.bf16 %v402_v1  ;;  %v407_v5 = vunpack.c.l.bf16 %v417_v4  ;;  %v408_v6 = vunpack.c.h.bf16 %v417_v4  ;;  %v419_v12 = vld [vmem:[%s132_s23 + $0x18] sm:$0xff]  }
  0x50   : > { %v411_v10 = vunpack.c.l.bf16 %v418_v7  ;;  %v412_v11 = vunpack.c.h.bf16 %v418_v7  ;;  %v415_v15 = vunpack.c.l.bf16 %v419_v12  ;;  %v416_v16 = vunpack.c.h.bf16 %v419_v12  ;;  %v165_v45 = vld [vmem:[#allocation2] sm:$0x1]  ;;  %v166_v46 = vld [vmem:[#allocation2 + $0x1] sm:$0x1]  ;;  %v167_v53 = vld [vmem:[#allocation2 + $0x2] sm:$0x1] }
  0x51   : > { %v189_v8 = vrot.slane %v403_v2, 4  ;;  %v195_v9 = vrot.slane %v404_v3, 4  ;;  %v201_v13 = vrot.slane %v407_v5, 4  ;;  %v207_v14 = vrot.slane %v408_v6, 4  ;;  %v168_v54 = vld [vmem:[#allocation2 + $0x3] sm:$0x1] }
  0x52   : > { %v213_v19 = vrot.slane %v411_v10, 4  ;;  %v219_v20 = vrot.slane %v412_v11, 4  ;;  %v225_v23 = vrot.slane %v415_v15, 4  ;;  %v231_v24 = vrot.slane %v416_v16, 4  ;;  %v169_v59 = vld [vmem:[#allocation2 + $0x4] sm:$0x1] }
  0x53   : > { %v190_v17 = vadd.f32 %v403_v2, %v189_v8  ;;  %v196_v18 = vadd.f32 %v404_v3, %v195_v9  ;;  %v202_v21 = vadd.f32 %v407_v5, %v201_v13  ;;  %v208_v22 = vadd.f32 %v408_v6, %v207_v14  ;;  %v170_v60 = vld [vmem:[#allocation2 + $0x5] sm:$0x1]  ;;  %v171_v3 = vld [vmem:[#allocation2 + $0x6] sm:$0x1]  ;;  %v172_v4 = vld [vmem:[#allocation2 + $0x7] sm:$0x1] }
  0x54   : > { %v214_v27 = vadd.f32 %v411_v10, %v213_v19  ;;  %v220_v28 = vadd.f32 %v412_v11, %v219_v20  ;;  %v226_v31 = vadd.f32 %v415_v15, %v225_v23  ;;  %v232_v32 = vadd.f32 %v416_v16, %v231_v24 }
  0x55   : > { %v191_v25 = vrot.slane %v190_v17, 2  ;;  %v197_v26 = vrot.slane %v196_v18, 2  ;;  %v203_v29 = vrot.slane %v202_v21, 2  ;;  %v209_v30 = vrot.slane %v208_v22, 2 }
  0x56   : > { %v215_v35 = vrot.slane %v214_v27, 2  ;;  %v221_v36 = vrot.slane %v220_v28, 2  ;;  %v227_v39 = vrot.slane %v226_v31, 2  ;;  %v233_v40 = vrot.slane %v232_v32, 2 }
  0x57   : > { %v192_v33 = vadd.f32 %v191_v25, %v190_v17  ;;  %v198_v34 = vadd.f32 %v197_v26, %v196_v18  ;;  %v204_v37 = vadd.f32 %v203_v29, %v202_v21  ;;  %v210_v38 = vadd.f32 %v209_v30, %v208_v22 }
  0x58   : > { %v216_v43 = vadd.f32 %v215_v35, %v214_v27  ;;  %v222_v44 = vadd.f32 %v221_v36, %v220_v28  ;;  %v228_v49 = vadd.f32 %v227_v39, %v226_v31  ;;  %v234_v50 = vadd.f32 %v233_v40, %v232_v32 }
  0x59   : > { %v193_v41 = vrot.slane %v192_v33, 1  ;;  %v199_v42 = vrot.slane %v198_v34, 1  ;;  %v205_v47 = vrot.slane %v204_v37, 1  ;;  %v211_v48 = vrot.slane %v210_v38, 1 }
  0x5a   : > { %v217_v55 = vrot.slane %v216_v43, 1  ;;  %v223_v56 = vrot.slane %v222_v44, 1  ;;  %v229_v61 = vrot.slane %v228_v49, 1  ;;  %v235_v62 = vrot.slane %v234_v50, 1 }
  0x5b   : > { %v194_v51 = vadd.f32 %v193_v41, %v192_v33  ;;  %v200_v52 = vadd.f32 %v199_v42, %v198_v34  ;;  %v206_v57 = vadd.f32 %v205_v47, %v204_v37  ;;  %v212_v58 = vadd.f32 %v211_v48, %v210_v38 }
  0x5c   : > { %v218_v1 = vadd.f32 %v217_v55, %v216_v43  ;;  %v224_v2 = vadd.f32 %v223_v56, %v222_v44  ;;  %v230_v7 = vadd.f32 %v229_v61, %v228_v49  ;;  %v236_v8 = vadd.f32 %v235_v62, %v234_v50  ;;  %256 = sbr.rel (%p393_p7) target bundleno = 110 (0x6e), region = 36 }
  0x5d   : > { %v237_v63 = vadd.f32 %v194_v51, %v165_v45  ;;  %v238_v0 = vadd.f32 %v200_v52, %v166_v46  ;;  %v239_v5 = vadd.f32 %v206_v57, %v167_v53  ;;  %v240_v6 = vadd.f32 %v212_v58, %v168_v54 }
  0x5e   : > { %v241_v9 = vadd.f32 %v218_v1, %v169_v59  ;;  %v242_v10 = vadd.f32 %v224_v2, %v170_v60  ;;  %v243_v11 = vadd.f32 %v230_v7, %v171_v3  ;;  %v244_v12 = vadd.f32 %v236_v8, %v172_v4 }
  0x5f   : > { %245 = vst [vmem:[#allocation2] sm:$0x1] %v237_v63  ;;  %246 = vst [vmem:[#allocation2 + $0x1] sm:$0x1] %v238_v0 }
  0x60   : > { %247 = vst [vmem:[#allocation2 + $0x2] sm:$0x1] %v239_v5  ;;  %248 = vst [vmem:[#allocation2 + $0x3] sm:$0x1] %v240_v6 }
  0x61   : > { %249 = vst [vmem:[#allocation2 + $0x4] sm:$0x1] %v241_v9  ;;  %250 = vst [vmem:[#allocation2 + $0x5] sm:$0x1] %v242_v10 }
  0x62   : > { %251 = vst [vmem:[#allocation2 + $0x6] sm:$0x1] %v243_v11  ;;  %252 = vst [vmem:[#allocation2 + $0x7] sm:$0x1] %v244_v12 }
  0x66   : > { %v257_v13 = vld [vmem:[#allocation2] sm:$0x1]  ;;  %v258_v14 = vld [vmem:[#allocation2 + $0x1] sm:$0x1] }
  0x67   : > { %v259_v15 = vld [vmem:[#allocation2 + $0x2] sm:$0x1]  ;;  %v265_v16 = vmul.f32 0.0625, %v257_v13  ;;  %v266_v17 = vmul.f32 0.0625, %v258_v14  ;;  %v260_v19 = vld [vmem:[#allocation2 + $0x3] sm:$0x1] }
  0x68   : > { %v267_v18 = vmul.f32 0.0625, %v259_v15  ;;  %v268_v20 = vmul.f32 0.0625, %v260_v19  ;;  %v261_v21 = vld [vmem:[#allocation2 + $0x4] sm:$0x1]  ;;  %v262_v22 = vld [vmem:[#allocation2 + $0x5] sm:$0x1] }
  0x69   : > { %273 = vst [vmem:[%s853_s21] sm:$0x1] %v265_v16  ;;  %274 = vst [vmem:[%s853_s21 + $0x1] sm:$0x1] %v266_v17  ;;  %v269_v23 = vmul.f32 0.0625, %v261_v21  ;;  %v270_v24 = vmul.f32 0.0625, %v262_v22 }
  0x6a   : > { %275 = vst [vmem:[%s853_s21 + $0x2] sm:$0x1] %v267_v18  ;;  %v263_v25 = vld [vmem:[#allocation2 + $0x6] sm:$0x1]  ;;  %v264_v26 = vld [vmem:[#allocation2 + $0x7] sm:$0x1] }
  0x6b   : > { %276 = vst [vmem:[%s853_s21 + $0x3] sm:$0x1] %v268_v20  ;;  %v271_v27 = vmul.f32 0.0625, %v263_v25  ;;  %v272_v28 = vmul.f32 0.0625, %v264_v26  ;;  %277 = vst [vmem:[%s853_s21 + $0x4] sm:$0x1] %v269_v23 }
  0x6c   : > { %278 = vst [vmem:[%s853_s21 + $0x5] sm:$0x1] %v270_v24 }
  0x6d   : > { %279 = vst [vmem:[%s853_s21 + $0x6] sm:$0x1] %v271_v27  ;;  %280 = vst [vmem:[%s853_s21 + $0x7] sm:$0x1] %v272_v28 }
  0x6e PF: > { %s400_s12 = sshll.u32 %s668_s13, 7  ;;  %s295_s5 = sshll.u32 %s853_s21, 4  ;;  %s872_s5 = int_to_ptr.vmem [resolvable:$true] %s295_s5 }
  0x6f   : > { %s869_s4 = scalar_lea.hbm %s938_s1, %s400_s12  ;;  %s876_s17 = scalar_lea.sflag [#allocation5], %s148_s9 }
  0x70   : > { %s558_s26 = scalar_lea.vmem %s872_s5, 128  ;;  %p945_p4 = scmp.ne.s32.totalorder %s942_s28, 0 }
  0x71   : > { %p559_p2 = scmp.ne.s32.totalorder %s872_s5, %s558_s26  ;;  %s687_s13 = smov [#allocation6]  }
  0x72   : > { %s562_s24 = sshll.u32 %s687_s13, 4  ;;  %s563_s24 = int_to_ptr.vmem [resolvable:$false] %s562_s24 }
  0x73   : > { %p560_p0 = pnand %p559_p2, %p945_p4  ;;  %s564_s3 = scalar_lea.vmem %s563_s24, 256 }
  0x74   : > { %p565_p5 = scmp.lt.s32.totalorder %s872_s5, %s563_s24  ;;  %p566_p8 = scmp.lt.s32.totalorder %s564_s3, %s558_s26 }
  0x75   : > { %p561_p1 = pneg %p560_p0 }
  0x76   : > { %p567_p3 = por %p566_p8, %p565_p5 }
  0x78   : > { %p568_p10 = pnand %p567_p3, %p561_p1 }
  0x7a   : > { %571 = shalt.err (!%p568_p10)
}
  0x7b   : > { %s572_s27 = scalar_lea.hbm %s869_s4, 128  ;;  %s576_s22 = scalar_lea.hbm %s938_s1, 256 }
  0x7c   : > { %p573_p11 = scmp.ne.s32.totalorder %s869_s4, %s572_s27  ;;  %p577_p13 = scmp.lt.u32.totalorder %s869_s4, %s938_s1 }
  0x7d   : > { %p578_p12 = scmp.lt.u32.totalorder %s576_s22, %s572_s27  ;;  %p580_p2 = scmp.lt.u32.totalorder %s572_s27, %s869_s4 }
  0x7e   : > { %p574_p6 = pnand %p573_p11, %p945_p4 }
  0x7f   : > { %p579_p7 = por %p578_p12, %p577_p13 }
  0x80   : > { %p575_p9 = pneg %p574_p6 }
  0x81   : > { %p581_p0 = por %p580_p2, %p579_p7 }
  0x83   : > { %p582_p1 = pnand %p581_p0, %p575_p9 }
  0x85   : > { %585 = shalt.err (!%p582_p1)
}
  0x86   : > { %s688_s25 = smov 16   ;;  %s689_s18 = smov 1  }
  0x87   : > { %422 = dma.vmem_to_hbm [thread:$0]  (%p945_p4), %s872_s5, 128, %s869_s4, %s876_s17, %s688_s25, %s688_s25, %s689_s18  }
  0x88 PF: > { %p433_p5 = scmp.ge.s32.totalorder %s680_s16, 2  ;;  %s310_s26 = sand.u32 1, %s640_s6  }
  0x89   : > { %p946_p8 = scmp.ne.s32.totalorder %s943_s2, 0  ;;  %s311_s13 = scalar_lea.sflag [#allocation5], %s310_s26 }
  0x8b   : > { %p429_p3 = pnand %p433_p5, %p946_p8 }
  0x8d   : > { %635 = dma.done.wait (!%p429_p3), %s311_s13, 128  }
  0x8e   : > { %637 = vsyncadd (!%p429_p3), %s311_s13, 4294967168  ;;  %s17_s16 = sadd.s32 1, %s680_s16   ;;  %s947_s6 = smov %s644_s7 }
  0x8f   : > { %p14_p10 = scmp.ge.s32.totalorder %s17_s16, 6   ;;  %s948_s7 = smov %s648_s8 }
  0x90   : > { %s949_s8 = smov %s787_s29  ;;  %s950_s9 = smov %s656_s10 }
  0x91   : > { %s951_s10 = smov %s660_s11  ;;  %s952_s11 = smov %s790_s30 }
  0x92   : > { %s953_s12 = smov %s672_s14  ;;  %s954_s13 = smov %s676_s15 }
  0x93   : > { %s955_s14 = smov %s958_s19  ;;  %s956_s15 = smov %s962_s20 }
  0x94   :  { %16 = sbr.rel (!%p14_p10) target bundleno = 9 (0x9), region = 77 }
  0x9b   :  { %316 = vsyncpa [#allocation4], 1 }
  0x9c   :  { %318 = vsyncpa [#allocation4 + $0x1], 1 }
  0x9d   :  { %319 = vsyncpa [#allocation5], 1 }
  0x9e   :  { %321 = vsyncpa [#allocation5 + $0x1], 1 }

</bundles_post_ra>
